<compile_context>
chip_gen: v7x
topology: tpu7x:2x2x1
jax: 0.10.0
libtpu: 0.0.40
codegen_flags: <defaults>
</compile_context>

<pallas_src>
import jax
import jax.numpy as jnp
from jax.experimental import pallas as pl
from jax.experimental.pallas import tpu as pltpu


def _cdiv(a: int, b: int) -> int:
    return -(-a // b)


def _round_up(a: int, b: int) -> int:
    return _cdiv(a, b) * b


def _dic_kernel(feat_ref, label_ref, acc_ref):
    """One grid step of the domain-invariant-concentration reduction.

    feat_ref : (TN, D)    block of features (original dtype)
    label_ref: (TN, 1)    block of labels
    acc_ref  : (1, 8, D)  f32 output block, resident across the inner
                          ("arbitrary") grid axis -> acts as the accumulator.
    """
    # Zero the per-partition accumulator on the first inner step.
    @pl.when(pl.program_id(1) == 0)
    def _():
        acc_ref[...] = jnp.zeros_like(acc_ref)

    f = feat_ref[...].astype(jnp.float32)        # .float() on the VPU
    lbl = label_ref[...].astype(jnp.float32)     # label.float(), (TN, 1)

    # label_i * |feat_ij| : VALU-only, no cross-lane work.
    w = jnp.abs(f) * lbl                         # (TN, D)
    tn, d = w.shape
    # Fold rows sublane-wise (groups of 8 rows) into the (1, 8, D) accumulator.
    # This is a free re-labelling of vreg tiles followed by VALU adds; the
    # expensive lane/sublane reduce is deferred to the wrapper (done once).
    acc_ref[...] += jnp.sum(w.reshape(1, tn // 8, 8, d), axis=1)


def domain_invariant_concentration(feat, label, reduction: str = "mean",
                                   *, max_tile_rows: int = 2048):
    """feat: (N, D) array, label: (N,) array. Returns scalar float32 loss."""
    if reduction not in ("mean", "sum"):
        raise ValueError(f"{reduction} is not a supported reduction method!")

    N, D = feat.shape
    itemsize = jnp.dtype(feat.dtype).itemsize
    # Sublane packing granularity: 8 rows for 4-byte, 16 for 2-byte, 32 for 1-byte.
    sub = {4: 8, 2: 16, 1: 32}.get(itemsize, 8)

    # Largest row tile such that the double-buffered feat tiles fit a
    # conservative VMEM budget (safe on v5e/v6e and v7x's 64 MiB physical VMEM).
    feat_buffer_budget = 16 * 1024 * 1024
    rows = feat_buffer_budget // (2 * D * itemsize)
    rows = max(sub, min(rows, max_tile_rows))
    rows = (rows // sub) * sub
    rows = min(rows, _round_up(N, sub))          # never larger than the problem
    rows = max(rows, sub)

    num_tiles = _cdiv(N, rows)
    # Outer parallel axis: 2 partitions -> both TensorCores on v7x
    # (harmless / sequential on single-TC v5e & v6e).
    parts = 2 if num_tiles >= 2 else 1
    inner = _cdiv(num_tiles, parts)
    padded_n = parts * inner * rows

    label2d = label.reshape(N, 1)
    if padded_n != N:
        pad = padded_n - N
        # Zero-padded labels contribute exactly 0 to the loss.
        feat = jnp.pad(feat, ((0, pad), (0, 0)))
        label2d = jnp.pad(label2d, ((0, pad), (0, 0)))

    partial = pl.pallas_call(
        _dic_kernel,
        out_shape=jax.ShapeDtypeStruct((parts, 8, D), jnp.float32),
        grid_spec=pltpu.PrefetchScalarGridSpec(
            num_scalar_prefetch=0,
            grid=(parts, inner),
            in_specs=[
                pl.BlockSpec((rows, D), lambda i, j: (i * inner + j, 0)),
                pl.BlockSpec((rows, 1), lambda i, j: (i * inner + j, 0)),
            ],
            # Per-partition accumulator block: same block for every inner step.
            out_specs=pl.BlockSpec((1, 8, D), lambda i, j: (i, 0, 0)),
        ),
        compiler_params=pltpu.CompilerParams(
            dimension_semantics=("parallel", "arbitrary"),
            vmem_limit_bytes=32 * 1024 * 1024,
        ),
    )(feat, label2d)

    # Single (tiny) final lane+sublane reduce, done once outside the kernel.
    loss = jnp.sum(partial)
    # torch.inner of 1-D label/norm is a 0-d tensor: .mean() == .sum() == loss.
    return loss


if __name__ == "__main__":
    key = jax.random.PRNGKey(0)
    k_feat, k_label = jax.random.split(key)

    # Small but representative shapes: N not a multiple of the small tile so the
    # padding / multi-tile / dual-partition paths are exercised too.
    N, D = 56, 128
    feat = jax.random.normal(k_feat, (N, D), dtype=jnp.float32)
    label = jax.random.bernoulli(k_label, 0.5, (N,)).astype(jnp.int32)

    # Pure-JAX reference.
    ref = jnp.dot(label.astype(jnp.float32),
                  jnp.sum(jnp.abs(feat.astype(jnp.float32)), axis=1))

    # Default path: single large tile, one partition.
    loss_mean = jax.block_until_ready(
        domain_invariant_concentration(feat, label, reduction="mean"))
    # Forced small tiles: 4 row tiles -> 2 parallel partitions + zero padding.
    loss_sum = jax.block_until_ready(
        domain_invariant_concentration(feat, label, reduction="sum",
                                       max_tile_rows=16))

    assert jnp.allclose(loss_mean, ref, rtol=1e-5, atol=1e-4), (loss_mean, ref)
    assert jnp.allclose(loss_sum, ref, rtol=1e-5, atol=1e-4), (loss_sum, ref)

    print("KERNEL_OK")
</pallas_src>

<mosaic_0001>
module attributes {stable_mosaic.version = 11 : i64} {
  func.func @_dic_kernel(%arg0: i32, %arg1: i32, %arg2: memref<56x128xf32, #tpu.memory_space<vmem>>, %arg3: memref<56x1xi32, #tpu.memory_space<vmem>>, %arg4: memref<1x8x128xf32, #tpu.memory_space<vmem>>) attributes {dimension_semantics = [#tpu.dimension_semantics<parallel>, #tpu.dimension_semantics<arbitrary>], iteration_bounds = array<i64: 1, 1>, scalar_prefetch = 0 : i64, scratch_operands = 0 : i64, tpu.core_type = #tpu.core_type<tc>, window_params = [{transform_indices = @transform_0, window_bounds = array<i64: 56, 128>}, {transform_indices = @transform_1, window_bounds = array<i64: 56, 1>}, {transform_indices = @transform_2, window_bounds = array<i64: 1, 8, 128>}]} {
    %c0_i32 = arith.constant 0 : i32
    %0 = arith.cmpi eq, %arg1, %c0_i32 : i32
    %1 = arith.extui %0 : i1 to i32
    %c0_i32_0 = arith.constant 0 : i32
    %2 = arith.cmpi ne, %1, %c0_i32_0 : i32
    scf.if %2 {
      %cst_10 = arith.constant 0.000000e+00 : f32
      %14 = vector.broadcast %cst_10 : f32 to vector<1x8x128xf32>
      %c0_11 = arith.constant 0 : index
      %c0_12 = arith.constant 0 : index
      %c0_13 = arith.constant 0 : index
      %15 = vector.load %arg4[%c0_11, %c0_12, %c0_13] : memref<1x8x128xf32, #tpu.memory_space<vmem>>, vector<1x8x128xf32>
      tpu.vector_store %arg4[%c0_11, %c0_12, %c0_13], %14 {strides = array<i32>} : memref<1x8x128xf32, #tpu.memory_space<vmem>>, vector<1x8x128xf32>,
    } else {
    }
    %c0 = arith.constant 0 : index
    %c0_1 = arith.constant 0 : index
    %3 = vector.load %arg2[%c0, %c0_1] : memref<56x128xf32, #tpu.memory_space<vmem>>, vector<56x128xf32>
    %c0_2 = arith.constant 0 : index
    %c0_3 = arith.constant 0 : index
    %4 = vector.load %arg3[%c0_2, %c0_3] : memref<56x1xi32, #tpu.memory_space<vmem>>, vector<56x1xi32>
    %5 = arith.sitofp %4 : vector<56x1xi32> to vector<56x1xf32>
    %6 = math.absf %3 : vector<56x128xf32>
    %7 = vector.broadcast %5 : vector<56x1xf32> to vector<56x128xf32>
    %8 = arith.mulf %6, %7 : vector<56x128xf32>
    %c0_4 = arith.constant 0 : index
    %c0_5 = arith.constant 0 : index
    %c0_6 = arith.constant 0 : index
    %9 = vector.load %arg4[%c0_4, %c0_5, %c0_6] : memref<1x8x128xf32, #tpu.memory_space<vmem>>, vector<1x8x128xf32>
    %10 = vector.shape_cast %8 : vector<56x128xf32> to vector<1x7x8x128xf32>
    %cst = arith.constant dense<0.000000e+00> : vector<1x8x128xf32>
    %11 = vector.multi_reduction <add>, %10, %cst [1] : vector<1x7x8x128xf32> to vector<1x8x128xf32>
    %12 = arith.addf %9, %11 : vector<1x8x128xf32>
    %c0_7 = arith.constant 0 : index
    %c0_8 = arith.constant 0 : index
    %c0_9 = arith.constant 0 : index
    %13 = vector.load %arg4[%c0_7, %c0_8, %c0_9] : memref<1x8x128xf32, #tpu.memory_space<vmem>>, vector<1x8x128xf32>
    tpu.vector_store %arg4[%c0_7, %c0_8, %c0_9], %12 {strides = array<i32>} : memref<1x8x128xf32, #tpu.memory_space<vmem>>, vector<1x8x128xf32>,
    return
  }
  func.func @transform_0(%arg0: i32, %arg1: i32) -> (i32, i32) {
    %c1_i32 = arith.constant 1 : i32
    %0 = arith.muli %arg0, %c1_i32 : i32
    %1 = arith.addi %0, %arg1 : i32
    %c0_i32 = arith.constant 0 : i32
    %c0_i32_0 = arith.constant 0 : i32
    return %1, %c0_i32 : i32, i32
  }
  func.func @transform_1(%arg0: i32, %arg1: i32) -> (i32, i32) {
    %c1_i32 = arith.constant 1 : i32
    %0 = arith.muli %arg0, %c1_i32 : i32
    %1 = arith.addi %0, %arg1 : i32
    %c0_i32 = arith.constant 0 : i32
    %c0_i32_0 = arith.constant 0 : i32
    return %1, %c0_i32 : i32, i32
  }
  func.func @transform_2(%arg0: i32, %arg1: i32) -> (i32, i32, i32) {
    %c0_i32 = arith.constant 0 : i32
    %c0_i32_0 = arith.constant 0 : i32
    %c0_i32_1 = arith.constant 0 : i32
    return %arg0, %c0_i32, %c0_i32_0 : i32, i32, i32
  }
}

</mosaic_0001>

<bundles_post_ra>
// kernel: tpu_custom_call.1
= control target key start
LH: loop header
LB: loop body
LE: loop exit
PB: predicated region body
PF: predicated region fallthrough
CT: control target
= control target key end

     0   :  { %v195_v3 = vmov 0   ;;  %s266_s0 = inlined_call_operand.vmem [shape: f32[56,128], index: 0, kind: input, shape index: {}]   ;;  %s267_s1 = inlined_call_operand.vmem [shape: s32[56,1], index: 1, kind: input, shape index: {}]   ;;  %s268_s2 = inlined_call_operand.hbm [shape: f32[1,8,128], index: 2, kind: output, shape index: {}]  }
   0x1   :  { %v70_v0 = vld [vmem:[%s267_s1 + $0x10] sm:$0xff]  ;;  %v68_v1 = vld [vmem:[%s267_s1] sm:$0xff]  ;;  %v71_v2 = vld [vmem:[%s267_s1 + $0x18] sm:$0xff]  ;;  %170 = vset.pattern.permute.xlu1 %v195_v3  ;;  %169 = vset.pattern.permute.xlu0 %v195_v3 }
   0x2   :  { %v77_v4 = vcvt.s32.f32 %v70_v0  ;;  %v75_v5 = vcvt.s32.f32 %v68_v1  ;;  %v69_v6 = vld [vmem:[%s267_s1 + $0x8] sm:$0xff]  ;;  %v78_v7 = vcvt.s32.f32 %v71_v2 }
   0x3   :  { %v76_v8 = vcvt.s32.f32 %v69_v6 }
   0x4   :  { %101 = vperm.xlu1 %170, %v77_v4   ;;  %91 = vperm.xlu0 %169, %v75_v5  }
   0x5   :  { %7 = vsyncpa [#allocation3], 0  ;;  %v73_v9 = vld [vmem:[%s267_s1 + $0x28] sm:$0xff]  ;;  %v72_v10 = vld [vmem:[%s267_s1 + $0x20] sm:$0xff]  ;;  %s196_s8 = smov [#allocation2]  }
   0x6   :  { %v80_v11 = vcvt.s32.f32 %v73_v9  ;;  %v79_v12 = vcvt.s32.f32 %v72_v10  ;;  %v74_v13 = vld [vmem:[%s267_s1 + $0x30] sm:$0xff]  ;;  %v61_v15 = vld [vmem:[%s266_s0] sm:$0xff]  ;;  %v62_v16 = vld [vmem:[%s266_s0 + $0x8] sm:$0xff]  ;;  %s146_s9 = sshll.u32 %s196_s8, 4  ;;  %s147_s9 = int_to_ptr.vmem [resolvable:$true] %s146_s9 }
   0x7   :  { %v81_v14 = vcvt.s32.f32 %v74_v13  ;;  %v63_v18 = vld [vmem:[%s266_s0 + $0x10] sm:$0xff]  ;;  %v82_v20 = vand.u32 2147483647, %v61_v15  ;;  %v83_v21 = vand.u32 2147483647, %v62_v16  ;;  %v64_v22 = vld [vmem:[%s266_s0 + $0x18] sm:$0xff]  ;;  %p176_p1 = scmp.lt.s32.totalorder %s147_s9, %s147_s9 }
   0x8   :  { %106 = vperm.xlu1 %170, %v78_v7   ;;  %96 = vperm.xlu0 %169, %v76_v8   ;;  %v84_v23 = vand.u32 2147483647, %v63_v18  ;;  %v65_v26 = vld [vmem:[%s266_s0 + $0x20] sm:$0xff]  ;;  %v85_v28 = vand.u32 2147483647, %v64_v22  ;;  %v66_v30 = vld [vmem:[%s266_s0 + $0x28] sm:$0xff] }
   0x9   :  { %v86_v33 = vand.u32 2147483647, %v65_v26  ;;  %v67_v35 = vld [vmem:[%s266_s0 + $0x30] sm:$0xff]  ;;  %v87_v38 = vand.u32 2147483647, %v66_v30  ;;  %s171_s10 = scalar_lea.vmem %s147_s9, 128 }
   0xa   :  { %v88_v42 = vand.u32 2147483647, %v67_v35  ;;  %p172_p0 = scmp.ne.s32.totalorder %s147_s9, %s171_s10  ;;  %p177_p2 = scmp.lt.s32.totalorder %s171_s10, %s171_s10 }
   0xc   :  { %116 = vperm.xlu1 %170, %v80_v11   ;;  %111 = vperm.xlu0 %169, %v79_v12   ;;  %p178_p3 = por %p177_p2, %p176_p1 }
   0xe   :  { %p179_p4 = pnand %p178_p3, %p172_p0 }
  0x10   :  { %121 = vperm.xlu0 %169, %v81_v14  }
  0x83   :  { %v102_v17 = vpop.permute.xlu1 %101  ;;  %v92_v19 = vpop.permute.xlu0 %91 }
  0x84   :  { %v124_v27 = vmul.f32 %v92_v19, %v82_v20  ;;  %v126_v31 = vmul.f32 %v102_v17, %v84_v23 }
  0x87   :  { %v107_v24 = vpop.permute.xlu1 %106  ;;  %v97_v25 = vpop.permute.xlu0 %96 }
  0x88   :  { %v125_v29 = vmul.f32 %v97_v25, %v83_v21  ;;  %v127_v36 = vmul.f32 %v107_v24, %v85_v28 }
  0x8a   :  { %v132_v32 = vadd.f32 %v125_v29, %v124_v27 }
  0x8b   :  { %v112_v34 = vpop.permute.xlu0 %111  ;;  %v117_v39 = vpop.permute.xlu1 %116 }
  0x8c   :  { %v133_v37 = vadd.f32 %v132_v32, %v126_v31  ;;  %v128_v40 = vmul.f32 %v112_v34, %v86_v33  ;;  %v129_v44 = vmul.f32 %v117_v39, %v87_v38 }
  0x8e   :  { %v134_v41 = vadd.f32 %v133_v37, %v127_v36 }
  0x8f   :  { %v122_v43 = vpop.permute.xlu0 %121 }
  0x90   :  { %v135_v45 = vadd.f32 %v134_v41, %v128_v40  ;;  %v130_v46 = vmul.f32 %v122_v43, %v88_v42 }
  0x92   :  { %v136_v47 = vadd.f32 %v135_v45, %v129_v44 }
  0x94   :  { %v137_v48 = vadd.f32 %v136_v47, %v130_v46 }
  0x96   :  { %139 = vst [vmem:[#allocation2] sm:$0xff] %v137_v48 }
  0x97   :  { %182 = shalt.err (!%p179_p4)
}
  0x98   :  { %s183_s12 = scalar_lea.hbm %s268_s2, 128 }
  0x99   :  { %p184_p5 = scmp.ne.s32.totalorder %s268_s2, %s183_s12  ;;  %p187_p6 = scmp.lt.u32.totalorder %s183_s12, %s268_s2 }
  0x9b   :  { %p189_p7 = pnand %p187_p6, %p184_p5 }
  0x9d   :  { %192 = shalt.err (!%p189_p7)
}
  0x9e   :  { %149 = dma.vmem_to_hbm [thread:$0]  %s147_s9, 128, %s268_s2, [#allocation3]  }
  0x9f   :  { %193 = dma.done.wait [#allocation3], 128  }
  0xa0   :  { %194 = vsyncadd [#allocation3], 4294967168 }
  0xa1   :  { %153 = vsyncpa [#allocation3], 1 }

</bundles_post_ra>
